<compile_context>
chip_gen: v7x
topology: tpu7x:2x2x1
jax: 0.10.0
libtpu: 0.0.40
codegen_flags: <defaults>
</compile_context>

<pallas_src>
import functools

import jax
import jax.numpy as jnp
from jax.experimental import pallas as pl
from jax.experimental.pallas import tpu as pltpu


def _mc_dropout_kernel(x_ref, w1_ref, b1_ref, w2_ref, b2_ref, mask_ref,
                       out_ref, *, keep_prob, samples_per_block, batch):
    # --- first layer (sample-invariant): computed once per grid block -------
    h = jnp.dot(x_ref[...], w1_ref[...], preferred_element_type=jnp.float32)
    h = jnp.maximum(h + b1_ref[...], 0.0)                       # (B, H)

    # --- replicate over this block's MC samples -> (S*B, H) -----------------
    hb = jnp.concatenate([h] * samples_per_block, axis=0)

    # --- inverted dropout: mask in {0,1}, scaled by 1/keep_prob -------------
    scale = jnp.float32(1.0 / keep_prob)
    hd = hb * (mask_ref[...] * scale)                           # (S*B, H)

    # --- output layer: ONE batched matmul for all samples in the block ------
    logits = jnp.dot(hd, w2_ref[...], preferred_element_type=jnp.float32)
    logits = logits + b2_ref[...]                               # (S*B, C)

    # --- numerically stable row softmax --------------------------------------
    m = jnp.max(logits, axis=-1, keepdims=True)
    e = jnp.exp(logits - m)
    probs = e / jnp.sum(e, axis=-1, keepdims=True)              # (S*B, C)

    # --- sum over this block's samples -> (B, C) partial sum -----------------
    acc = probs[0:batch, :]
    for s in range(1, samples_per_block):                       # static unroll
        acc = acc + probs[s * batch:(s + 1) * batch, :]
    out_ref[...] = acc.astype(out_ref.dtype)


def _make_keep_mask(key, n_mc, batch, hidden, keep_prob):
    """Dropout keep-mask for all MC samples, sample-major rows: (n_mc*B, H)."""
    if keep_prob < 1.0:
        keep = jax.random.bernoulli(key, p=keep_prob,
                                    shape=(n_mc * batch, hidden))
        return keep.astype(jnp.float32)
    return jnp.ones((n_mc * batch, hidden), jnp.float32)


def mc_dropout_forward(x, w1, b1, w2, b2, *, rng_key,
                       n_mcsamples=50, dropout_p=0.25):
    """DropoutWrapper.forward: mean over n_mcsamples of softmax(net(x)[0], -1)."""
    B, Din = x.shape
    H = w1.shape[1]
    C = w2.shape[1]
    keep_prob = 1.0 - float(dropout_p)

    # Split MC samples over a small 'parallel' grid axis (both TCs on v7x).
    n_split = 2 if (n_mcsamples % 2 == 0 and n_mcsamples >= 2 and B % 8 == 0) else 1
    spb = n_mcsamples // n_split                # samples per grid block

    mask = _make_keep_mask(rng_key, n_mcsamples, B, H, keep_prob)

    kernel = functools.partial(_mc_dropout_kernel,
                               keep_prob=keep_prob,
                               samples_per_block=spb,
                               batch=B)

    partial_sums = pl.pallas_call(
        kernel,
        out_shape=jax.ShapeDtypeStruct((n_split * B, C), jnp.float32),
        grid=(n_split,),
        in_specs=[
            pl.BlockSpec((B, Din),     lambda c: (0, 0)),   # x     (reused)
            pl.BlockSpec((Din, H),     lambda c: (0, 0)),   # W1    (reused)
            pl.BlockSpec((1, H),       lambda c: (0, 0)),   # b1    (reused)
            pl.BlockSpec((H, C),       lambda c: (0, 0)),   # W2    (reused)
            pl.BlockSpec((1, C),       lambda c: (0, 0)),   # b2    (reused)
            pl.BlockSpec((spb * B, H), lambda c: (c, 0)),   # per-block masks
        ],
        out_specs=pl.BlockSpec((B, C), lambda c: (c, 0)),
        compiler_params=pltpu.CompilerParams(
            dimension_semantics=("parallel",)),             # independent blocks
    )(x, w1, b1, w2, b2, mask)

    # Combine block partial sums -> mean over all MC samples.
    return partial_sums.reshape(n_split, B, C).sum(axis=0) / n_mcsamples


def _reference_forward(x, w1, b1, w2, b2, mask, n_mc, keep_prob):
    """Pure-JAX reference using the same precomputed dropout masks."""
    B = x.shape[0]
    h = jnp.maximum(x @ w1 + b1, 0.0)                           # (B, H)
    m = mask.reshape(n_mc, B, -1)
    hd = h[None] * m / keep_prob                                # (n_mc, B, H)
    logits = jnp.einsum("sbh,hc->sbc", hd, w2) + b2             # (n_mc, B, C)
    probs = jax.nn.softmax(logits, axis=-1)
    return probs.mean(axis=0)


if __name__ == "__main__":
    # Small shapes: batch=8, in_features=32, hidden=64, classes=16
    B, Din, H, C = 8, 32, 64, 16
    n_mc = 8            # module default is 50; small count for the demo
    dropout_p = 0.25
    keep_prob = 1.0 - dropout_p

    key = jax.random.PRNGKey(0)
    kx, k1, k2, kmask = jax.random.split(key, 4)

    x = jax.random.normal(kx, (B, Din), dtype=jnp.float32)
    # deterministic synthetic parameters (no checkpoint loading)
    w1 = jax.random.normal(k1, (Din, H), dtype=jnp.float32) * 0.1
    b1 = jnp.zeros((1, H), dtype=jnp.float32)
    w2 = jax.random.normal(k2, (H, C), dtype=jnp.float32) * 0.1
    b2 = jnp.zeros((1, C), dtype=jnp.float32)

    probs = mc_dropout_forward(x, w1, b1, w2, b2, rng_key=kmask,
                               n_mcsamples=n_mc, dropout_p=dropout_p)
    probs = jax.block_until_ready(probs)

    # sanity: rows of averaged softmax must sum to ~1 and lie in [0, 1]
    row_sums = jnp.sum(probs, axis=-1)
    assert jnp.allclose(row_sums, jnp.ones_like(row_sums), atol=1e-4), row_sums
    assert bool(jnp.all(probs >= 0.0)) and bool(jnp.all(probs <= 1.0))

    # numerical check against a pure-JAX reference with the SAME masks
    mask = _make_keep_mask(kmask, n_mc, B, H, keep_prob)
    ref = _reference_forward(x, w1, b1, w2, b2, mask, n_mc, keep_prob)
    assert jnp.allclose(probs, ref, atol=1e-5), jnp.max(jnp.abs(probs - ref))

    print("KERNEL_OK")
</pallas_src>

<mosaic_0001>
module attributes {stable_mosaic.version = 11 : i64} {
  func.func @_mc_dropout_kernel(%arg0: i32, %arg1: memref<8x32xf32, #tpu.memory_space<vmem>>, %arg2: memref<32x64xf32, #tpu.memory_space<vmem>>, %arg3: memref<1x64xf32, #tpu.memory_space<vmem>>, %arg4: memref<64x16xf32, #tpu.memory_space<vmem>>, %arg5: memref<1x16xf32, #tpu.memory_space<vmem>>, %arg6: memref<32x64xf32, #tpu.memory_space<vmem>>, %arg7: memref<8x16xf32, #tpu.memory_space<vmem>>) attributes {dimension_semantics = [#tpu.dimension_semantics<parallel>], iteration_bounds = array<i64: 2>, scalar_prefetch = 0 : i64, scratch_operands = 0 : i64, tpu.core_type = #tpu.core_type<tc>, window_params = [{pipeline_mode = #tpu.pipeline_mode<synchronous>, transform_indices = @transform_0, window_bounds = array<i64: 8, 32>}, {pipeline_mode = #tpu.pipeline_mode<synchronous>, transform_indices = @transform_1, window_bounds = array<i64: 32, 64>}, {pipeline_mode = #tpu.pipeline_mode<synchronous>, transform_indices = @transform_2, window_bounds = array<i64: 1, 64>}, {pipeline_mode = #tpu.pipeline_mode<synchronous>, transform_indices = @transform_3, window_bounds = array<i64: 64, 16>}, {pipeline_mode = #tpu.pipeline_mode<synchronous>, transform_indices = @transform_4, window_bounds = array<i64: 1, 16>}, {transform_indices = @transform_5, window_bounds = array<i64: 32, 64>}, {transform_indices = @transform_6, window_bounds = array<i64: 8, 16>}]} {
    %c0 = arith.constant 0 : index
    %c0_0 = arith.constant 0 : index
    %0 = vector.load %arg1[%c0, %c0_0] : memref<8x32xf32, #tpu.memory_space<vmem>>, vector<8x32xf32>
    %c0_1 = arith.constant 0 : index
    %c0_2 = arith.constant 0 : index
    %1 = vector.load %arg2[%c0_1, %c0_2] : memref<32x64xf32, #tpu.memory_space<vmem>>, vector<32x64xf32>
    %cst = arith.constant dense<0.000000e+00> : vector<8x64xf32>
    %2 = tpu.matmul %0, %1, %cst {dimension_numbers = #tpu.dot_dimension_numbers<[1], [0], [0], [1], [0, 0, 1, 1], [], []>} : vector<8x32xf32>, vector<32x64xf32>, vector<8x64xf32> -> vector<8x64xf32>
    %c0_3 = arith.constant 0 : index
    %c0_4 = arith.constant 0 : index
    %3 = vector.load %arg3[%c0_3, %c0_4] : memref<1x64xf32, #tpu.memory_space<vmem>>, vector<1x64xf32>
    %4 = vector.broadcast %3 : vector<1x64xf32> to vector<8x64xf32>
    %5 = arith.addf %2, %4 : vector<8x64xf32>
    %cst_5 = arith.constant 0.000000e+00 : f32
    %6 = vector.broadcast %cst_5 : f32 to vector<8x64xf32>
    %7 = arith.maximumf %5, %6 : vector<8x64xf32>
    %8 = tpu.concatenate %7, %7, %7, %7 in 0 : vector<8x64xf32>, vector<8x64xf32>, vector<8x64xf32>, vector<8x64xf32> -> vector<32x64xf32>
    %c0_6 = arith.constant 0 : index
    %c0_7 = arith.constant 0 : index
    %9 = vector.load %arg6[%c0_6, %c0_7] : memref<32x64xf32, #tpu.memory_space<vmem>>, vector<32x64xf32>
    %cst_8 = arith.constant 1.33333337 : f32
    %10 = vector.broadcast %cst_8 : f32 to vector<32x64xf32>
    %11 = arith.mulf %9, %10 : vector<32x64xf32>
    %12 = arith.mulf %8, %11 : vector<32x64xf32>
    %c0_9 = arith.constant 0 : index
    %c0_10 = arith.constant 0 : index
    %13 = vector.load %arg4[%c0_9, %c0_10] : memref<64x16xf32, #tpu.memory_space<vmem>>, vector<64x16xf32>
    %cst_11 = arith.constant dense<0.000000e+00> : vector<32x16xf32>
    %14 = tpu.matmul %12, %13, %cst_11 {dimension_numbers = #tpu.dot_dimension_numbers<[1], [0], [0], [1], [0, 0, 1, 1], [], []>} : vector<32x64xf32>, vector<64x16xf32>, vector<32x16xf32> -> vector<32x16xf32>
    %c0_12 = arith.constant 0 : index
    %c0_13 = arith.constant 0 : index
    %15 = vector.load %arg5[%c0_12, %c0_13] : memref<1x16xf32, #tpu.memory_space<vmem>>, vector<1x16xf32>
    %16 = vector.broadcast %15 : vector<1x16xf32> to vector<32x16xf32>
    %17 = arith.addf %14, %16 : vector<32x16xf32>
    %cst_14 = arith.constant dense<0xFF800000> : vector<32xf32>
    %18 = vector.multi_reduction <maximumf>, %17, %cst_14 [1] : vector<32x16xf32> to vector<32xf32>
    %19 = vector.shape_cast %18 : vector<32xf32> to vector<32x1xf32>
    %20 = vector.broadcast %19 : vector<32x1xf32> to vector<32x16xf32>
    %21 = arith.subf %17, %20 : vector<32x16xf32>
    %22 = math.exp %21 : vector<32x16xf32>
    %cst_15 = arith.constant dense<0.000000e+00> : vector<32xf32>
    %23 = vector.multi_reduction <add>, %22, %cst_15 [1] : vector<32x16xf32> to vector<32xf32>
    %24 = vector.shape_cast %23 : vector<32xf32> to vector<32x1xf32>
    %25 = vector.broadcast %24 : vector<32x1xf32> to vector<32x16xf32>
    %26 = arith.divf %22, %25 : vector<32x16xf32>
    %27 = vector.extract_strided_slice %26 {offsets = [0, 0], sizes = [8, 16], strides = [1, 1]} : vector<32x16xf32> to vector<8x16xf32>
    %28 = vector.extract_strided_slice %26 {offsets = [8, 0], sizes = [8, 16], strides = [1, 1]} : vector<32x16xf32> to vector<8x16xf32>
    %29 = arith.addf %27, %28 : vector<8x16xf32>
    %30 = vector.extract_strided_slice %26 {offsets = [16, 0], sizes = [8, 16], strides = [1, 1]} : vector<32x16xf32> to vector<8x16xf32>
    %31 = arith.addf %29, %30 : vector<8x16xf32>
    %32 = vector.extract_strided_slice %26 {offsets = [24, 0], sizes = [8, 16], strides = [1, 1]} : vector<32x16xf32> to vector<8x16xf32>
    %33 = arith.addf %31, %32 : vector<8x16xf32>
    %c0_16 = arith.constant 0 : index
    %c0_17 = arith.constant 0 : index
    %34 = vector.load %arg7[%c0_16, %c0_17] : memref<8x16xf32, #tpu.memory_space<vmem>>, vector<8x16xf32>
    tpu.vector_store %arg7[%c0_16, %c0_17], %33 {strides = array<i32>} : memref<8x16xf32, #tpu.memory_space<vmem>>, vector<8x16xf32>,
    return
  }
  func.func @transform_0(%arg0: i32) -> (i32, i32) {
    %c0_i32 = arith.constant 0 : i32
    %c0_i32_0 = arith.constant 0 : i32
    %c0_i32_1 = arith.constant 0 : i32
    return %c0_i32, %c0_i32_0 : i32, i32
  }
  func.func @transform_1(%arg0: i32) -> (i32, i32) {
    %c0_i32 = arith.constant 0 : i32
    %c0_i32_0 = arith.constant 0 : i32
    %c0_i32_1 = arith.constant 0 : i32
    return %c0_i32, %c0_i32_0 : i32, i32
  }
  func.func @transform_2(%arg0: i32) -> (i32, i32) {
    %c0_i32 = arith.constant 0 : i32
    %c0_i32_0 = arith.constant 0 : i32
    %c0_i32_1 = arith.constant 0 : i32
    return %c0_i32, %c0_i32_0 : i32, i32
  }
  func.func @transform_3(%arg0: i32) -> (i32, i32) {
    %c0_i32 = arith.constant 0 : i32
    %c0_i32_0 = arith.constant 0 : i32
    %c0_i32_1 = arith.constant 0 : i32
    return %c0_i32, %c0_i32_0 : i32, i32
  }
  func.func @transform_4(%arg0: i32) -> (i32, i32) {
    %c0_i32 = arith.constant 0 : i32
    %c0_i32_0 = arith.constant 0 : i32
    %c0_i32_1 = arith.constant 0 : i32
    return %c0_i32, %c0_i32_0 : i32, i32
  }
  func.func @transform_5(%arg0: i32) -> (i32, i32) {
    %c0_i32 = arith.constant 0 : i32
    %c0_i32_0 = arith.constant 0 : i32
    return %arg0, %c0_i32 : i32, i32
  }
  func.func @transform_6(%arg0: i32) -> (i32, i32) {
    %c0_i32 = arith.constant 0 : i32
    %c0_i32_0 = arith.constant 0 : i32
    return %arg0, %c0_i32 : i32, i32
  }
}

</mosaic_0001>

<bundles_post_ra>
// kernel: tpu_custom_call.1
= control target key start
LH: loop header
LB: loop body
LE: loop exit
PB: predicated region body
PF: predicated region fallthrough
CT: control target
= control target key end

     0   :  { %11 = vsyncpa [#allocation3], 0  ;;  %s1093_s0 = inlined_call_operand.hbm [shape: f32[8,32], index: 0, kind: input, shape index: {}]   ;;  %s1094_s1 = inlined_call_operand.vmem [shape: f32[32,64], index: 1, kind: input, shape index: {}]   ;;  %s1095_s2 = inlined_call_operand.vmem [shape: f32[1,64], index: 2, kind: input, shape index: {}]   ;;  %s1096_s3 = inlined_call_operand.vmem [shape: f32[64,16], index: 3, kind: input, shape index: {}]   ;;  %s1097_s4 = inlined_call_operand.vmem [shape: f32[1,16], index: 4, kind: input, shape index: {}]   ;;  %s1098_s5 = inlined_call_operand.vmem [shape: f32[64,64], index: 5, kind: input, shape index: {}]   ;;  %s1099_s6 = inlined_call_operand.hbm [shape: f32[16,16], index: 6, kind: output, shape index: {}]  }
   0x1   :  { %12 = vsyncpa [#allocation4], 0 }
   0x2   :  { %14 = vsyncpa [#allocation4 + $0x1], 0  ;;  %s908_s21 = smov 0   ;;  %s910_s22 = smov 0  }
   0x3   :  { %s912_s23 = smov 0   ;;  %s914_s24 = smov 0  }
   0x4 LB: > { %s929_s25 = sadd.s32 4294967295, %s866_s24   ;;  %s611_s26 = sadd.s32 4294967294, %s866_s24   ;;  %s866_s24 = sphi %s914_s24, %s1115_s24   ;;  %s862_s23 = sphi %s912_s23, %s1114_s23   ;;  %s858_s22 = sphi %s910_s22, %s1113_s22   ;;  %s854_s21 = sphi %s908_s21, %s1112_s21  }
   0x5   : > { %s933_s27 = sadd.s32 1, %s866_s24   ;;  %s158_s28 = sadd.s32 1, %s862_s23 }
   0x6   : > { %s155_s29 = ssub.s32 %s866_s24, %s933_s27  ;;  %p168_p0 = scmp.ne.s32.totalorder %s862_s23, %s858_s22 }
   0x7   : > { %p156_p1 = scmp.eq.s32.totalorder %s155_s29, 0  ;;  %p169_p2 = scmp.eq.s32.totalorder %s929_s25, 1 }
   0x8   : > { %p174_p3 = scmp.ne.s32.totalorder %s858_s22, %s854_s21  ;;  %p175_p4 = scmp.eq.s32.totalorder %s611_s26, 1 }
   0x9   : > { %s944_s30 = scalar_select %p156_p1, %s862_s23, %s158_s28  }
   0xa   : > { %p946_p5 = por %p169_p2, %p168_p0  ;;  %p950_p6 = por %p175_p4, %p174_p3 }
   0xb   : > { %p612_p7 = scmp.ge.s32.totalorder %s866_s24, 1  ;;  %p182_p8 = scmp.lt.s32.totalorder %s866_s24, 3 }
   0xc   : > { %s1103_s7 = scalar_select %p946_p5, 1, 0 }
   0xd   : > { %s1104_s8 = scalar_select %p950_p6, 1, 0 }
   0xe   : > { %p1100_p9 = scmp.eq.s32.totalorder %s929_s25, 0  ;;  %p957_p10 = pnand %p612_p7, %p182_p8 }
   0xf   : > { %s868_s10 = smov [#allocation2]   ;;  %s772_s15 = scalar_lea.hbm %s1093_s0, 128 }
  0x10   : > { %s1105_s9 = scalar_select %p957_p10, 1, 0 }
  0x11   : > { %s195_s11 = sshll.u32 %s868_s10, 4  ;;  %p709_p11 = pneg %p957_p10  ;;  %s196_s11 = int_to_ptr.vmem [resolvable:$true] %s195_s11 }
  0x12   : > { %p773_p13 = scmp.ne.s32.totalorder %s1093_s0, %s772_s15  ;;  %p779_p3 = scmp.lt.u32.totalorder %s772_s15, %s1093_s0 }
  0x13   : > { %p965_p12 = pnand %p1100_p9, %p709_p11 }
  0x15   : > { %p774_p0 = pneg %p965_p12 }
  0x17   : > { %p775_p1 = pnand %p774_p0, %p773_p13 }
  0x19   : > { %p776_p2 = pneg %p775_p1 }
  0x1b   : > { %p781_p4 = pnand %p779_p3, %p776_p2 }
  0x1d   : > { %784 = shalt.err (!%p781_p4)
}
  0x1e   : > { %s785_s20 = scalar_lea.vmem %s196_s11, 128  ;;  %p793_p9 = scmp.lt.s32.totalorder %s196_s11, %s196_s11 }
  0x1f   : > { %p786_p7 = scmp.ne.s32.totalorder %s196_s11, %s785_s20  ;;  %p794_p6 = scmp.lt.s32.totalorder %s785_s20, %s785_s20 }
  0x21   : > { %p788_p8 = pnand %p786_p7, %p774_p0  ;;  %p795_p5 = por %p794_p6, %p793_p9 }
  0x23   : > { %p789_p11 = pneg %p788_p8 }
  0x25   : > { %p796_p10 = pnand %p795_p5, %p789_p11 }
  0x27   : > { %799 = shalt.err (!%p796_p10)
}
  0x28   : > { %712 = dma.hbm_to_vmem [thread:$0]  (!%p965_p12), %s1093_s0, 128, %s196_s11, [#allocation3]  }
  0x29   : > { %p1107_p13 = scmp.ne.s32.totalorder %s1105_s9, 0 }
  0x2a   : > { %p1108_p1 = scmp.eq.s32.totalorder (!%p1107_p13), %s929_s25, 0 }
  0x2b   : > { %229 = sbr.rel (%p1107_p13) target bundleno = 834 (0x342), region = 44 }
  0x32   : > { %845 = dma.done.wait (%p1108_p1), [#allocation3], 128   ;;  %p1109_p0 = pmov %p1108_p1 }
  0x33   : > { %v869_v0 = vmov 0.0|0.0   ;;  %vm870_vm0 = vmmov 0   ;;  %v871_v1 = vmov 0.0   ;;  %v266_v2 = vld [vmem:[%s1094_s1] sm:$0xff]  ;;  %v267_v3 = vld [vmem:[%s1094_s1 + $0x8] sm:$0xff]  ;;  %v268_v4 = vld [vmem:[%s1094_s1 + $0x10] sm:$0xff] }
  0x34   : > { %847 = vsyncadd (%p1109_p0), [#allocation3], 4294967168  ;;  %681 = vmatprep.subr.bf16.mxu0 %v869_v0  ;;  %656 = vmatprep.mubr.msk.f32.mxu0 %vm870_vm0, %v871_v1  ;;  %v682_v5 = vpack.c.bf16 %v267_v3, %v266_v2  ;;  %v269_v6 = vld [vmem:[%s1094_s1 + $0x18] sm:$0xff]  ;;  %v364_v7 = vld [vmem:[%s1096_s3] sm:$0xff]  ;;  %vm277_vm1 = vcmask 261120   ;;  %s618_s17 = sshll.u32 %s929_s25, 2 }
  0x35   : > { %v365_v8 = vld [vmem:[%s1096_s3 + $0x8] sm:$0xff]  ;;  %v366_v9 = vld [vmem:[%s1096_s3 + $0x10] sm:$0xff]  ;;  %v367_v10 = vld [vmem:[%s1096_s3 + $0x18] sm:$0xff]  ;;  %v685_v11 = vpack.c.bf16 %v269_v6, %v268_v4  ;;  %p260_p5 = scmp.lt.s32.totalorder %s618_s17, 7  ;;  %vm379_vm2 = vcmask 523264   ;;  %vm477_vm3 = vcmask 130048  }
  0x36   : > { %683 = vmatpush3.bf16.msra.mxu0 %v682_v5  ;;  %v687_v12 = vpack.c.bf16 %v365_v8, %v364_v7  ;;  %v691_v13 = vpack.c.bf16 %v367_v10, %v366_v9  ;;  %v265_v14 = vld [vmem:[#allocation2] sm:$0xff]  ;;  %v369_v16 = vld [vmem:[%s1096_s3 + $0x28] sm:$0xff]  ;;  %v370_v18 = vld [vmem:[%s1096_s3 + $0x30] sm:$0xff]  ;;  %s256_s11 = sand.u32 1, %s858_s22   ;;  %s628_s13 = sshll.u32 %s929_s25, 7 }
  0x37   : > { %684 = vmatprep.subr.bf16.mxu0 %v869_v0  ;;  %v368_v15 = vld [vmem:[%s1096_s3 + $0x20] sm:$0xff]  ;;  %v371_v19 = vld [vmem:[%s1096_s3 + $0x38] sm:$0xff]  ;;  %s1117_s17 = smov (!%p260_p5, %s618_s17), 7  ;;  %s617_s9 = sshll.u32 %s256_s11, 3 }
  0x38   : > { %688 = vmatprep.subr.bf16.mxu1 %v687_v12  ;;  %v695_v17 = vpack.c.bf16 %v369_v16, %v368_v15  ;;  %v699_v20 = vpack.c.bf16 %v371_v19, %v370_v18  ;;  %s619_s18 = sshll.u32 %s1117_s17, 3  ;;  %v620_v21 = vld [vmem:[%s1095_s2] ss:$0 sm:$0xff]  ;;  %s258_s14 = scalar_lea.vmem [#allocation5], %s617_s9 }
  0x39   : > { %690 = vmatpush3.bf16.msra.mxu1 %v687_v12  ;;  %s263_s26 = scalar_lea.vmem %s1098_s5, %s619_s18  ;;  %v622_v38 = vld [vmem:[%s1097_s4] ss:$0 sm:$0xff]  ;;  %s540_s15 = sshll.u32 %s258_s14, 4  ;;  %s1052_s15 = int_to_ptr.vmem [resolvable:$true] %s540_s15 }
  0x3a   : > { %686 = vmatpush3.bf16.msra.mxu0 %v685_v11  ;;  %692 = vmatprep.subr.bf16.mxu1 %v691_v13  ;;  %v352_v22 = vld [vmem:[%s263_s26] sm:$0xff]  ;;  %v353_v23 = vld [vmem:[%s263_s26 + $0x8] sm:$0xff]  ;;  %v354_v25 = vld [vmem:[%s263_s26 + $0x10] sm:$0xff]  ;;  %s1050_s18 = scalar_lea.hbm %s1099_s6, %s628_s13  ;;  %s527_s19 = scalar_lea.sflag [#allocation4], %s256_s11 }
  0x3b   : > { %v356_v28 = vmul.f32 1.3333334, %v352_v22  ;;  %v357_v29 = vmul.f32 1.3333334, %v353_v23  ;;  %v358_v31 = vmul.f32 1.3333334, %v354_v25 }
  0x3c   : > { %v355_v32 = vld [vmem:[%s263_s26 + $0x18] sm:$0xff]  ;;  %s800_s20 = scalar_lea.vmem %s1052_s15, 128  ;;  %p1110_p9 = scmp.ne.s32.totalorder %s1103_s7, 0 }
  0x3d   : > { %657 = vmatmul.mubr.msk.f32.vlgmr.msra.gmra.mrb[0].mxu0 %vm277_vm1, %v265_v14  ;;  %694 = vmatpush3.bf16.msra.mxu1 %v691_v13  ;;  %v359_v35 = vmul.f32 1.3333334, %v355_v32  ;;  %p801_p6 = scmp.ne.s32.totalorder %s1052_s15, %s800_s20  ;;  %s872_s25 = smov [#allocation5]  }
  0x3e   : > { %696 = vmatprep.subr.bf16.mxu1 %v695_v17  ;;  %s804_s26 = sshll.u32 %s872_s25, 4  ;;  %s805_s26 = int_to_ptr.vmem [resolvable:$false] %s804_s26 }
  0x3f   : > { %p802_p10 = pnand %p801_p6, %p1110_p9  ;;  %s806_s28 = scalar_lea.vmem %s805_s26, 256 }
  0x40   : > { %p807_p2 = scmp.lt.s32.totalorder %s1052_s15, %s805_s26  ;;  %p808_p3 = scmp.lt.s32.totalorder %s806_s28, %s800_s20 }
  0x41   : > { %698 = vmatpush3.bf16.msra.mxu1 %v695_v17  ;;  %p803_p12 = pneg %p802_p10 }
  0x42   : > { %700 = vmatprep.subr.bf16.mxu1 %v699_v20  ;;  %p809_p4 = por %p808_p3, %p807_p2 }
  0x44   : > { %p810_p7 = pnand %p809_p4, %p803_p12 }
  0x45   : > { %702 = vmatpush3.bf16.msra.mxu1 %v699_v20 }
 0x110   : > { %v347_v24 = vpop.f32.mrb[0].mxu0 }
 0x111   : > { %v348_v26 = vadd.f32 %v620_v21, %v347_v24  ;;  %v658_v27 = vpop.f32.mrb[1].mxu0 }
 0x113   : > { %v351_v30 = vmax.f32 %v348_v26, 0.0 }
 0x115   : > { %v360_v33 = vmul.f32 %v356_v28, %v351_v30  ;;  %v361_v34 = vmul.f32 %v357_v29, %v351_v30  ;;  %v362_v36 = vmul.f32 %v358_v31, %v351_v30  ;;  %v363_v37 = vmul.f32 %v359_v35, %v351_v30 }
 0x117   : > { %675 = vmatprep.mubr.msk.f32.mxu1 %vm379_vm2, %v360_v33 }
 0x118   : > { %676 = vmatmul.mubr.msk.f32.vlgmr.msra.gmra.mrb[0].mxu1 %vm379_vm2, %v361_v34 }
 0x119   : > { %678 = vmatprep.mubr.msk.f32.mxu1 %vm379_vm2, %v362_v36 }
 0x11c   : > { %679 = vmatmul.mubr.msk.f32.gmra.mrb[2].mxu1 %vm379_vm2, %v363_v37 }
 0x1eb   : > { %v677_v39 = vpop.f32.mrb[0].mxu1 }
 0x1ec   : > { %v458_v40 = vpop.f32.mrb[1].mxu1  ;;  %v464_v42 = vadd.f32 %v677_v39, %v622_v38 }
 0x1ed   : > { %v459_v41 = vadd.f32 %v622_v38, %v458_v40 }
 0x1ee   : > { %v481_v49 = vsel %vm477_vm3, %v464_v42, -inf }
 0x1ef   : > { %v680_v43 = vpop.f32.mrb[2].mxu1  ;;  %v478_v44 = vsel %vm477_vm3, %v459_v41, -inf }
 0x1f0   : > { %v468_v45 = vpop.f32.mrb[3].mxu1  ;;  %479 = vmax.xlane.f32.xlu0 %v478_v44  ;;  %v474_v47 = vadd.f32 %v680_v43, %v622_v38 }
 0x1f1   : > { %v469_v46 = vadd.f32 %v622_v38, %v468_v45 }
 0x1f2   : > { %v487_v50 = vsel %vm477_vm3, %v474_v47, -inf }
 0x1f3   : > { %v484_v48 = vsel %vm477_vm3, %v469_v46, -inf }
 0x1f4   : > { %485 = vmax.xlane.f32.xlu1 %v484_v48  ;;  %482 = vmax.xlane.f32.xlu0 %v481_v49 }
 0x1f8   : > { %488 = vmax.xlane.f32.xlu1 %v487_v50 }
 0x27d   : > { %v480_v51 = vpop.xlane.xlu0 %479 }
 0x27e   : > { %v490_v52 = vsub.f32 %v459_v41, %v480_v51 }
 0x280   : > { %v494_v53 = vmul.f32 1.442695, %v490_v52 }
 0x281   : > { %v486_v54 = vpop.xlane.xlu1 %485  ;;  %v483_v55 = vpop.xlane.xlu0 %482 }
 0x282   : > { %756 = vpow2.f32 %v494_v53  ;;  %v492_v56 = vsub.f32 %v469_v46, %v486_v54  ;;  %v491_v57 = vsub.f32 %v464_v42, %v483_v55 }
 0x284   : > { %v498_v58 = vmul.f32 1.442695, %v492_v56  ;;  %v496_v59 = vmul.f32 1.442695, %v491_v57 }
 0x285   : > { %v489_v60 = vpop.xlane.xlu1 %488 }
 0x286   : > { %758 = vpow2.f32 %v498_v58  ;;  %v493_v61 = vsub.f32 %v474_v47, %v489_v60 }
 0x287   : > { %760 = vpow2.f32 %v496_v59 }
 0x288   : > { %v500_v62 = vmul.f32 1.442695, %v493_v61 }
 0x28a   : > { %762 = vpow2.f32 %v500_v62 }
 0x28c   : > { %v757_v63 = vpop.eup %756 }
 0x28d   : > { %v502_v0 = vsel %vm477_vm3, %v757_v63, 0.0 }
 0x28e   : > { %503 = vadd.xlane.f32.xlu0 %v502_v0 }
 0x290   : > { %v759_v1 = vpop.eup %758 }
 0x291   : > { %v761_v2 = vpop.eup %760  ;;  %v508_v3 = vsel %vm477_vm3, %v759_v1, 0.0 }
 0x292   : > { %509 = vadd.xlane.f32.xlu0 %v508_v3  ;;  %v505_v4 = vsel %vm477_vm3, %v761_v2, 0.0 }
 0x293   : > { %506 = vadd.xlane.f32.xlu1 %v505_v4 }
 0x294   : > { %v763_v5 = vpop.eup %762 }
 0x295   : > { %v511_v6 = vsel %vm477_vm3, %v763_v5, 0.0 }
 0x297   : > { %512 = vadd.xlane.f32.xlu1 %v511_v6 }
 0x31b   : > { %v504_v7 = vpop.xlane.xlu0 %503 }
 0x31c   : > { %764 = vrcp.f32 %v504_v7 }
 0x31f   : > { %v510_v8 = vpop.xlane.xlu0 %509 }
 0x320   : > { %v507_v9 = vpop.xlane.xlu1 %506  ;;  %766 = vrcp.f32 %v510_v8 }
 0x321   : > { %768 = vrcp.f32 %v507_v9 }
 0x324   : > { %v513_v10 = vpop.xlane.xlu1 %512 }
 0x325   : > { %770 = vrcp.f32 %v513_v10 }
 0x326   : > { %v765_v11 = vpop.eup %764 }
 0x327   : > { %v515_v14 = vmul.f32 %v765_v11, %v757_v63 }
 0x32a   : > { %v767_v12 = vpop.eup %766 }
 0x32b   : > { %v769_v13 = vpop.eup %768  ;;  %v519_v17 = vmul.f32 %v767_v12, %v759_v1 }
 0x32c   : > { %v517_v15 = vmul.f32 %v769_v13, %v761_v2 }
 0x32e   : > { %v522_v16 = vadd.f32 %v517_v15, %v515_v14 }
 0x32f   : > { %v771_v18 = vpop.eup %770 }
 0x330   : > { %v523_v19 = vadd.f32 %v522_v16, %v519_v17  ;;  %v521_v20 = vmul.f32 %v771_v18, %v763_v5 }
 0x332   : > { %v524_v21 = vadd.f32 %v523_v19, %v521_v20 }
 0x334   : > { %525 = vst.msk [vmem:[%s258_s14] sm:$0xff] %vm477_vm3, %v524_v21 }
 0x335   : > { %813 = shalt.err (!%p810_p7)
}
 0x336   : > { %s814_s29 = scalar_lea.hbm %s1050_s18, 128  ;;  %s818_s11 = scalar_lea.hbm %s1099_s6, 256 }
 0x337   : > { %p815_p8 = scmp.ne.s32.totalorder %s1050_s18, %s814_s29  ;;  %p819_p1 = scmp.lt.u32.totalorder %s1050_s18, %s1099_s6 }
 0x338   : > { %p820_p0 = scmp.lt.u32.totalorder %s818_s11, %s814_s29  ;;  %p822_p6 = scmp.lt.u32.totalorder %s814_s29, %s1050_s18 }
 0x339   : > { %p816_p11 = pnand %p815_p8, %p1110_p9 }
 0x33a   : > { %p821_p5 = por %p820_p0, %p819_p1 }
 0x33b   : > { %p817_p13 = pneg %p816_p11 }
 0x33c   : > { %p823_p10 = por %p822_p6, %p821_p5 }
 0x33e   : > { %p824_p12 = pnand %p823_p10, %p817_p13 }
 0x340   : > { %827 = shalt.err (!%p824_p12)
}
 0x341   : > { %707 = dma.vmem_to_hbm [thread:$0]  (%p1110_p9), %s1052_s15, 128, %s1050_s18, %s527_s19  }
 0x342 PF: > { %p719_p2 = scmp.ge.s32.totalorder %s866_s24, 2  ;;  %s552_s14 = sand.u32 1, %s854_s21  }
 0x343   : > { %p1111_p3 = scmp.ne.s32.totalorder %s1104_s8, 0  ;;  %s553_s16 = scalar_lea.sflag [#allocation4], %s552_s14 }
 0x345   : > { %p714_p4 = pnand %p719_p2, %p1111_p3 }
 0x347   : > { %849 = dma.done.wait (!%p714_p4), %s553_s16, 128  }
 0x348   : > { %851 = vsyncadd (!%p714_p4), %s553_s16, 4294967168  ;;  %p17_p7 = scmp.ge.s32.totalorder %s933_s27, 4   ;;  %s1112_s21 = smov %s858_s22 }
 0x349   : > { %s1113_s22 = smov %s862_s23  ;;  %s1114_s23 = smov %s944_s30 }
 0x34a   : > { %s1115_s24 = smov %s933_s27  ;;  %19 = sbr.rel (!%p17_p7) target bundleno = 4 (0x4), region = 84 }
 0x351   :  { %558 = vsyncpa [#allocation3], 1 }
 0x352   :  { %560 = vsyncpa [#allocation3 + $0x1], 1 }
 0x353   :  { %561 = vsyncpa [#allocation4], 1 }
 0x354   :  { %563 = vsyncpa [#allocation4 + $0x1], 1 }

</bundles_post_ra>
